<compile_context>
chip_gen: v6e
topology: v6e:2x2x1
jax: 0.10.0
libtpu: 0.0.40
codegen_flags: <defaults>
</compile_context>

<pallas_src>
import functools

import jax
import jax.numpy as jnp
from jax.experimental import pallas as pl
from jax.experimental.pallas import tpu as pltpu

EPS = 1e-5
CP = 16  # channel-block padding = bf16 sublane-packing granularity


# --------------------------- pltpu.roll capability probe ----------------------


@functools.cache
def _roll_caps():
    """One-time on-device probe of pltpu.roll.

    Returns (sign, bf16_ok):
      sign    = +1 if pltpu.roll matches np.roll's shift direction, -1 if flipped.
      bf16_ok = True if a bf16 lane rotate lowers and matches the f32 direction.
    """
    def mk(dtype):
        def probe(x_ref, o_ref):
            o_ref[...] = pltpu.roll(x_ref[...], 1, axis=1)
        x = jnp.tile(jnp.arange(128, dtype=jnp.float32)[None, :], (16, 1)).astype(dtype)
        y = pl.pallas_call(probe, out_shape=jax.ShapeDtypeStruct((16, 128), dtype))(x)
        if bool(jnp.array_equal(y, jnp.roll(x, 1, axis=1))):
            return 1
        if bool(jnp.array_equal(y, jnp.roll(x, -1, axis=1))):
            return -1
        return 0

    sign = mk(jnp.float32)
    assert sign != 0, "pltpu.roll probe: unexpected rotation semantics"
    try:
        bf16_ok = mk(jnp.bfloat16) == sign
    except Exception:  # lowering not supported for bf16 rotate -> f32 fallback
        bf16_ok = False
    return sign, bf16_ok


# ------------------------------- Pallas kernel --------------------------------


def _convblock_kernel(H, W, N, has_ds, roll_sign, roll_bf16, *refs):
    """Fused ConvBlock forward; whole batch resident in VMEM.

    Activations are (CP, P) f32: channels (zero-padded to CP=16) on sublanes,
    flattened zero-padded pixels on lanes.  Conv weights arrive pre-packed as
    bf16 (CP, 9*CP) with tap/channel blocks padded to CP so every sublane
    concat is tile-aligned.  x_ref is exactly zero at pad rows/columns; m_ref
    (1, P) and mcol_ref (P, 1) are 1.0 at real pixels.
    """
    if has_ds:
        (x_ref, m_ref, mcol_ref, g1, b1, g2, b2, g3, b3, g4, b4,
         wf_ref, w2_ref, w3_ref, out_ref) = refs
    else:
        (x_ref, m_ref, mcol_ref, g1, b1, g2, b2, g3, b3,
         wf_ref, w2_ref, w3_ref, out_ref) = refs
        g4 = b4 = None

    Wp = W + 2
    inv_cnt = 1.0 / float(N * H * W)

    x = x_ref[...]            # (CP, P) f32
    mask = m_ref[...]         # (1, P)  f32
    mcol = mcol_ref[...]      # (P, 1)  f32
    P = x.shape[1]

    def stats(v):
        # BN batch stats on the MXU: one (2*CP, P) @ (P, 1) dot gives the
        # per-channel sum and sum-of-squares over real pixels only (the mask
        # multiply is fused into the contraction; the XLU/VALU stay free).
        # Biased variance, clamped at 0 against E[x^2] - mean^2 cancellation.
        s2 = jnp.dot(jnp.concatenate([v, v * v], axis=0), mcol,
                     preferred_element_type=jnp.float32)           # (2*CP, 1)
        mean = s2[:CP] * inv_cnt
        var = jnp.maximum(s2[CP:] * inv_cnt - mean * mean, 0.0)
        return mean, var

    def bn_relu_mask(v, gamma_ref, beta_ref, mean, var):
        scale = gamma_ref[...] * jax.lax.rsqrt(var + EPS)           # (CP, 1)
        bias = beta_ref[...] - mean * scale
        return jnp.maximum(v * scale + bias, 0.0) * mask            # pad cols -> 0

    # 3x3 tap offsets in the flattened (row-major, zero-padded) pixel axis.
    offs = [(kh - 1) * Wp + (kw - 1) for kh in range(3) for kw in range(3)]

    def taps(y):
        # z[:, p] = y[:, p + off] via an XLU lane rotation.  Wrap-around only
        # ever lands in border/pad columns (each image starts and ends with a
        # full zero border row, so >= Wp+1 masked columns flank the buffer);
        # those columns are re-zeroed by `mask` before the next stage and
        # cropped by the wrapper.  Blocks are returned in bf16 (MXU operands).
        if roll_bf16:
            yb = y.astype(jnp.bfloat16)
            return [pltpu.roll(yb, (-roll_sign * o) % P, axis=1) if o else yb
                    for o in offs]
        return [(pltpu.roll(y, (-roll_sign * o) % P, axis=1) if o else y
                 ).astype(jnp.bfloat16) for o in offs]

    # BN1 and BN4 normalize the same x -> shared batch statistics.
    mx, vx = stats(x)
    y1 = bn_relu_mask(x, g1, b1, mx, vx)
    tail = bn_relu_mask(x, g4, b4, mx, vx) if has_ds else x

    # Fused stage-1 conv3x3 + residual 1x1: block-diagonal LHS against the
    # CP-aligned [9 taps || tail] slab -> one MXU push yields o1 and res.
    slab1 = jnp.concatenate(taps(y1) + [tail.astype(jnp.bfloat16)], axis=0)
    r1 = jnp.dot(wf_ref[...], slab1, preferred_element_type=jnp.float32)  # (4*CP, P)
    o1, res = r1[:CP], r1[CP:]

    m1, v1 = stats(o1)
    o2 = jnp.dot(w2_ref[...],
                 jnp.concatenate(taps(bn_relu_mask(o1, g2, b2, m1, v1)), axis=0),
                 preferred_element_type=jnp.float32)                  # (CP, P)
    m2, v2 = stats(o2)
    o3 = jnp.dot(w3_ref[...],
                 jnp.concatenate(taps(bn_relu_mask(o2, g3, b3, m2, v2)), axis=0),
                 preferred_element_type=jnp.float32)                  # (CP, P)

    # Channel concat along sublanes at CP-aligned offsets; single lane-dense store.
    out_ref[...] = jnp.concatenate([o1, o2, o3], axis=0) + res


# ------------------------------ wrapper / launch -------------------------------


def conv_block_forward(x_nchw, params):
    """Pallas implementation of ConvBlock.forward (norm='batch', training mode)."""
    N, Cin, H, W = x_nchw.shape
    Hp, Wp = H + 2, W + 2
    P = N * Hp * Wp
    P_pad = ((P + 127) // 128) * 128
    C2 = int(params["w1"].shape[0])
    C4 = int(params["w2"].shape[0])
    C4b = int(params["w3"].shape[0])
    Ctot = C2 + C4 + C4b
    has_ds = "w_ds" in params
    assert max(Cin, C2, C4, C4b) <= CP, \
        "TODO(synk): generalize per-stage CP for larger channel counts"

    roll_sign, roll_bf16 = _roll_caps()

    # Channels on sublanes (zero-padded to CP), flattened zero-padded pixels on
    # lanes (padded to a multiple of 128 -> lane-dense load/store).
    xp = jnp.pad(x_nchw.astype(jnp.float32), ((0, 0), (0, 0), (1, 1), (1, 1)))
    x_cp = jnp.transpose(xp, (1, 0, 2, 3)).reshape(Cin, P)
    x_cp = jnp.pad(x_cp, ((0, CP - Cin), (0, P_pad - P)))

    m = jnp.zeros((Hp, Wp), jnp.float32).at[1:H + 1, 1:W + 1].set(1.0)
    mask = jnp.pad(jnp.tile(m.reshape(1, -1), (1, N)), ((0, 0), (0, P_pad - P)))
    mask_col = mask.reshape(P_pad, 1)

    def col(v):  # per-channel BN param -> zero-padded (CP, 1) column
        return jnp.pad(v.astype(jnp.float32).reshape(-1, 1),
                       ((0, CP - v.shape[0]), (0, 0)))

    def w2d(w):  # (Co, Ci, 3, 3) -> f32 (CP, 9*CP); column block t=3*kh+kw, zero-padded
        co, ci = w.shape[:2]
        wt = jnp.transpose(w.astype(jnp.float32), (2, 3, 1, 0)).reshape(9, ci, co)
        wp = jnp.zeros((9, CP, co), jnp.float32).at[:, :ci, :].set(wt)
        return jnp.pad(wp.reshape(9 * CP, co).T, ((0, CP - co), (0, 0)))

    # Residual 1x1 weight scattered into the padded cat-row layout (3*CP, CP).
    if has_ds:
        wres = params["w_ds"].reshape(Ctot, Cin).astype(jnp.float32)
    else:
        assert Cin == Ctot
        wres = jnp.eye(Ctot, dtype=jnp.float32)         # residual = x
    wres_rows = jnp.zeros((3 * CP, Cin), jnp.float32)
    wres_rows = wres_rows.at[0:C2].set(wres[0:C2])
    wres_rows = wres_rows.at[CP:CP + C4].set(wres[C2:C2 + C4])
    wres_rows = wres_rows.at[2 * CP:2 * CP + C4b].set(wres[C2 + C4:])
    wres_pad = jnp.pad(wres_rows, ((0, 0), (0, CP - Cin)))

    # Fused stage-1 + residual LHS: block-diagonal (4*CP, 10*CP).
    w_fused = jnp.zeros((4 * CP, 10 * CP), jnp.float32)
    w_fused = w_fused.at[:CP, :9 * CP].set(w2d(params["w1"]))
    w_fused = w_fused.at[CP:, 9 * CP:].set(wres_pad)

    inputs = [x_cp, mask, mask_col,
              col(params["g1"]), col(params["b1"]),
              col(params["g2"]), col(params["b2"]),
              col(params["g3"]), col(params["b3"])]
    if has_ds:
        inputs += [col(params["g4"]), col(params["b4"])]
    inputs += [w_fused.astype(jnp.bfloat16),
               w2d(params["w2"]).astype(jnp.bfloat16),
               w2d(params["w3"]).astype(jnp.bfloat16)]

    out2d = pl.pallas_call(
        functools.partial(_convblock_kernel, H, W, N, has_ds, roll_sign, roll_bf16),
        out_shape=jax.ShapeDtypeStruct((3 * CP, P_pad), jnp.float32),
        grid=(1,),  # whole batch per step: BN batch stats couple all images
        # TODO(synk): tile the pixel axis (>=512-lane blocks, "parallel") with a
        # split-stats pass and explicit vmem_limit_bytes at production sizes.
        in_specs=[pl.BlockSpec(a.shape, lambda i: (0, 0)) for a in inputs],
        out_specs=pl.BlockSpec((3 * CP, P_pad), lambda i: (0, 0)),
        compiler_params=pltpu.CompilerParams(dimension_semantics=("arbitrary",)),
    )(*inputs)

    # Drop pad channels / pad pixels, back to NCHW.
    out_rows = jnp.concatenate([out2d[0:C2], out2d[CP:CP + C4],
                                out2d[2 * CP:2 * CP + C4b]], axis=0)
    out = out_rows[:, :P].reshape(Ctot, N, Hp, Wp)[:, :, 1:H + 1, 1:W + 1]
    return jnp.transpose(out, (1, 0, 2, 3))


# ------------------------------ pure-JAX reference -----------------------------


def ref_forward(x_nchw, params):
    x = x_nchw.astype(jnp.float32)

    def bn(v, g, b):
        mu = v.mean(axis=(0, 2, 3), keepdims=True)
        var = v.var(axis=(0, 2, 3), keepdims=True)
        return (v - mu) / jnp.sqrt(var + EPS) * g.reshape(1, -1, 1, 1) \
            + b.reshape(1, -1, 1, 1)

    def conv(v, w, pad):
        return jax.lax.conv_general_dilated(
            v, w, window_strides=(1, 1), padding=((pad, pad), (pad, pad)),
            dimension_numbers=("NCHW", "OIHW", "NCHW"),
            precision=jax.lax.Precision.HIGHEST)

    o1 = conv(jax.nn.relu(bn(x, params["g1"], params["b1"])), params["w1"], 1)
    o2 = conv(jax.nn.relu(bn(o1, params["g2"], params["b2"])), params["w2"], 1)
    o3 = conv(jax.nn.relu(bn(o2, params["g3"], params["b3"])), params["w3"], 1)
    cat = jnp.concatenate([o1, o2, o3], axis=1)
    if "w_ds" in params:
        res = conv(jax.nn.relu(bn(x, params["g4"], params["b4"])), params["w_ds"], 0)
    else:
        res = x
    return cat + res


# ----------------------------------- main --------------------------------------


if __name__ == "__main__":
    N, Cin, H, W = 2, 4, 16, 16
    out_planes = 8
    C2, C4 = out_planes // 2, out_planes // 4

    keys = jax.random.split(jax.random.PRNGKey(0), 13)
    x = jax.random.normal(keys[0], (N, Cin, H, W), jnp.float32)

    # PyTorch-layout weights: conv (Cout, Cin, 3, 3), downsample (Cout, Cin, 1, 1)
    params = {
        "w1": 0.3 * jax.random.normal(keys[1], (C2, Cin, 3, 3), jnp.float32),
        "w2": 0.3 * jax.random.normal(keys[2], (C4, C2, 3, 3), jnp.float32),
        "w3": 0.3 * jax.random.normal(keys[3], (C4, C4, 3, 3), jnp.float32),
        "w_ds": 0.3 * jax.random.normal(keys[4], (out_planes, Cin, 1, 1), jnp.float32),
        "g1": 1.0 + 0.1 * jax.random.normal(keys[5], (Cin,), jnp.float32),
        "b1": 0.1 * jax.random.normal(keys[6], (Cin,), jnp.float32),
        "g2": 1.0 + 0.1 * jax.random.normal(keys[7], (C2,), jnp.float32),
        "b2": 0.1 * jax.random.normal(keys[8], (C2,), jnp.float32),
        "g3": 1.0 + 0.1 * jax.random.normal(keys[9], (C4,), jnp.float32),
        "b3": 0.1 * jax.random.normal(keys[10], (C4,), jnp.float32),
        "g4": 1.0 + 0.1 * jax.random.normal(keys[11], (Cin,), jnp.float32),
        "b4": 0.1 * jax.random.normal(keys[12], (Cin,), jnp.float32),
    }

    _roll_caps()  # prime the rotate-direction/bf16 probe outside jit tracing

    out = jax.block_until_ready(jax.jit(conv_block_forward)(x, params))
    ref = jax.block_until_ready(ref_forward(x, params))

    assert out.shape == (N, out_planes, H, W), out.shape
    max_err = float(jnp.max(jnp.abs(out - ref)))
    # Tolerance reflects bf16 MXU operands (f32 accumulation) across 3 chained convs.
    assert jnp.allclose(out, ref, atol=3e-2, rtol=1e-2), max_err
    print("KERNEL_OK")
</pallas_src>

<mosaic_0001>
module attributes {stable_mosaic.version = 11 : i64} {
  func.func @probe(%arg0: memref<16x128xf32, #tpu.memory_space<vmem>>, %arg1: memref<16x128xf32, #tpu.memory_space<vmem>>) attributes {dimension_semantics = [], scalar_prefetch = 0 : i64, scratch_operands = 0 : i64, tpu.core_type = #tpu.core_type<tc>} {
    %c0 = arith.constant 0 : index
    %c0_0 = arith.constant 0 : index
    %0 = vector.load %arg0[%c0, %c0_0] : memref<16x128xf32, #tpu.memory_space<vmem>>, vector<16x128xf32>
    %c1_i32 = arith.constant 1 : i32
    %1 = tpu.dynamic_rotate %0 by %c1_i32 dim 1 : vector<16x128xf32>, i32 -> vector<16x128xf32>
    %c0_1 = arith.constant 0 : index
    %c0_2 = arith.constant 0 : index
    %2 = vector.load %arg1[%c0_1, %c0_2] : memref<16x128xf32, #tpu.memory_space<vmem>>, vector<16x128xf32>
    tpu.vector_store %arg1[%c0_1, %c0_2], %1 {strides = array<i32>} : memref<16x128xf32, #tpu.memory_space<vmem>>, vector<16x128xf32>,
    return
  }
}

</mosaic_0001>

<bundles_post_ra>
// kernel: tpu_custom_call.1
= control target key start
LH: loop header
LB: loop body
LE: loop exit
PB: predicated region body
PF: predicated region fallthrough
CT: control target
= control target key end

     0   :  { %6 = vsyncpa [#allocation3], 0  ;;  %s118_s0 = inlined_call_operand.hbm [shape: f32[16,128], index: 0, kind: input, shape index: {}]   ;;  %s119_s1 = inlined_call_operand.hbm [shape: f32[16,128], index: 1, kind: output, shape index: {}]  }
   0x1   :  { %7 = vsyncpa [#allocation4], 0  ;;  %s97_s6 = smov [#allocation2]  }
   0x2   :  { %s13_s7 = sshll.u32 %s97_s6, 4  ;;  %s14_s7 = int_to_ptr.vmem [resolvable:$true] %s13_s7 }
   0x3   :  { %s61_s8 = scalar_lea.vmem %s14_s7, 256  ;;  %p66_p1 = scmp.lt.s32.totalorder %s14_s7, %s14_s7 }
   0x4   :  { %p62_p0 = scmp.ne.s32.totalorder %s14_s7, %s61_s8  ;;  %p67_p2 = scmp.lt.s32.totalorder %s61_s8, %s61_s8 }
   0x6   :  { %p68_p3 = por %p67_p2, %p66_p1 }
   0x8   :  { %p69_p4 = pnand %p68_p3, %p62_p0 }
   0xa   :  { %72 = shalt.err (!%p69_p4)
}
   0xb   :  { %s98_s9 = smov 128   ;;  %s99_s10 = smov 8  }
   0xc   :  { %19 = dma.hbm_to_vmem [thread:$0]  %s118_s0, 256, %s14_s7, [#allocation3], %s98_s9, %s98_s9, %s99_s10  }
   0xd   :  { %93 = dma.done.wait [#allocation3], 256  }
   0xe   :  { %94 = vsyncadd [#allocation3], 4294967040  ;;  %v23_v0 = vld [vmem:[#allocation2] sm:$0xff]  ;;  %s100_s13 = smov 1   ;;  %v24_v1 = vld [vmem:[#allocation2 + $0x8] sm:$0xff]  ;;  %s101_s14 = smov [#allocation5]  }
   0xf   :  { %25 = vrot.lane.b32.xlu0 %v23_v0, %s100_s13  ;;  %s36_s15 = sshll.u32 %s101_s14, 4  ;;  %s37_s15 = int_to_ptr.vmem [resolvable:$true] %s36_s15 }
  0x10   :  { %s73_s16 = scalar_lea.vmem %s37_s15, 256  ;;  %p78_p6 = scmp.lt.s32.totalorder %s37_s15, %s37_s15 }
  0x11   :  { %p74_p5 = scmp.ne.s32.totalorder %s37_s15, %s73_s16  ;;  %p79_p7 = scmp.lt.s32.totalorder %s73_s16, %s73_s16 }
  0x13   :  { %27 = vrot.lane.b32.xlu0 %v24_v1, %s100_s13  ;;  %p80_p8 = por %p79_p7, %p78_p6 }
  0x15   :  { %p81_p9 = pnand %p80_p8, %p74_p5 }
  0x81   :  { %v26_v2 = vpop.permute.xlu0 %25 }
  0x82   :  { %29 = vst [vmem:[#allocation5] sm:$0xff] %v26_v2 }
  0x85   :  { %v28_v3 = vpop.permute.xlu0 %27 }
  0x86   :  { %30 = vst [vmem:[#allocation5 + $0x8] sm:$0xff] %v28_v3 }
  0x87   :  { %84 = shalt.err (!%p81_p9)
}
  0x88   :  { %42 = dma.vmem_to_hbm [thread:$0]  %s37_s15, 256, %s119_s1, [#allocation4], %s98_s9, %s98_s9, %s99_s10  }
  0x89   :  { %95 = dma.done.wait [#allocation4], 256  }
  0x8a   :  { %96 = vsyncadd [#allocation4], 4294967040 }
  0x8b   :  { %46 = vsyncpa [#allocation3], 1 }
  0x8c   :  { %47 = vsyncpa [#allocation4], 1 }

</bundles_post_ra>
